<compile_context>
chip_gen: v6e
topology: v6e:2x2x1
jax: 0.10.0
libtpu: 0.0.40
codegen_flags: <defaults>
</compile_context>

<pallas_src>
import functools

import jax
import jax.numpy as jnp
import numpy as np
from jax import lax
from jax.experimental import pallas as pl
from jax.experimental.pallas import tpu as pltpu


# ----------------------------- config ---------------------------------------
class Qwen2Config:
    hidden_size = 32
    num_attention_heads = 4
    num_key_value_heads = 2
    attention_dropout = 0.0
    rope_theta = 10000.0


# ----------------------------- helpers ---------------------------------------
@functools.lru_cache(maxsize=None)
def _vmem_limit_bytes():
    """Scoped-VMEM budget that is safe on v5e/v6e (128 MiB) and v7x (64 MiB)."""
    try:
        cap = int(pltpu.get_tpu_info().vmem_capacity_bytes)
    except Exception:
        cap = 64 * 1024 * 1024
    return int(min(cap * 3 // 4, 96 * 1024 * 1024))


def _fit_tile(dim, target):
    """Largest tile <= target (halving) that evenly divides dim, else full dim."""
    if dim <= target:
        return dim
    t = target
    while dim % t != 0:
        t //= 2
        if t < 8:
            return dim
    return t


def _rotate_half_matrix(head_dim):
    """(D, D) matrix R such that x @ R == rotate_half(x) == concat(-x2, x1)."""
    half = head_dim // 2
    r = np.zeros((head_dim, head_dim), np.float32)
    r[np.arange(half) + half, np.arange(half)] = -1.0
    r[np.arange(half), np.arange(half) + half] = 1.0
    return jnp.asarray(r)


# ------------------------ fused / tiled linear kernel ------------------------
def _linear_kernel(x_ref, w_ref, b_ref, o_ref, acc_ref):
    k = pl.program_id(2)

    @pl.when(k == 0)
    def _init():
        acc_ref[...] = jnp.zeros_like(acc_ref)

    acc_ref[...] += jnp.dot(x_ref[...], w_ref[...],
                            preferred_element_type=jnp.float32)

    @pl.when(k == pl.num_programs(2) - 1)
    def _finalize():
        o_ref[...] = (acc_ref[...] + b_ref[...]).astype(o_ref.dtype)


def linear(x, w, b, *, tm=256, tn=512, tk=512):
    """x: (M, K); w: (K, N) pre-transposed; b: (N,) or None."""
    M, K = x.shape
    K2, N = w.shape
    assert K == K2
    if b is None:
        b = jnp.zeros((N,), jnp.float32)
    b2 = b.reshape(1, N).astype(jnp.float32)

    tm = _fit_tile(M, tm)
    tn = _fit_tile(N, tn)
    tk = _fit_tile(K, tk)
    grid = (M // tm, N // tn, K // tk)

    return pl.pallas_call(
        _linear_kernel,
        grid=grid,
        in_specs=[
            pl.BlockSpec((tm, tk), lambda i, j, k: (i, k)),
            pl.BlockSpec((tk, tn), lambda i, j, k: (k, j)),
            pl.BlockSpec((1, tn), lambda i, j, k: (0, j)),
        ],
        out_specs=pl.BlockSpec((tm, tn), lambda i, j, k: (i, j)),
        out_shape=jax.ShapeDtypeStruct((M, N), x.dtype),
        scratch_shapes=[pltpu.VMEM((tm, tn), jnp.float32)],
        compiler_params=pltpu.CompilerParams(
            dimension_semantics=("parallel", "parallel", "arbitrary"),
            vmem_limit_bytes=_vmem_limit_bytes(),
        ),
    )(x, w, b2)


# ----------------------- flash attention (GQA + RoPE) ------------------------
def _flash_attn_kernel(q_ref, k_ref, v_ref, cos_q_ref, sin_q_ref, cos_k_ref,
                       sin_k_ref, rot_ref, o_ref, m_scr, l_scr, acc_scr, q_scr,
                       *, scaling):
    qi = pl.program_id(2)
    ki = pl.program_id(3)
    nk = pl.num_programs(3)
    n_rep, tq, d = q_ref.shape[1], q_ref.shape[2], q_ref.shape[3]
    tk = k_ref.shape[2]

    @pl.when(ki == 0)
    def _init():
        m_scr[...] = jnp.full_like(m_scr, -jnp.inf)
        l_scr[...] = jnp.zeros_like(l_scr)
        acc_scr[...] = jnp.zeros_like(acc_scr)
        # RoPE-rotate + pre-scale the Q tile once per (b, kv_head, q_tile) and
        # cache it; it is reused for every KV tile.
        rot = rot_ref[...]                                    # (D, D) f32
        qf = q_ref[0].astype(jnp.float32)                     # (n_rep, tq, D)
        rot_b = jnp.broadcast_to(rot[None], (n_rep, d, d))
        q_rot = jnp.einsum("rqd,rde->rqe", qf, rot_b,
                           preferred_element_type=jnp.float32)
        q_rope = (qf * cos_q_ref[...] + q_rot * sin_q_ref[...]) * scaling
        q_scr[...] = q_rope.astype(q_scr.dtype)

    # Skip KV tiles that lie entirely in the (masked) future of this Q tile.
    @pl.when(ki * tk < (qi + 1) * tq)
    def _compute():
        rot = rot_ref[...]
        # RoPE on the K tile (shared by the n_rep query heads of this group).
        kf = k_ref[0, 0].astype(jnp.float32)                  # (tk, D)
        k_rope = (kf * cos_k_ref[0]
                  + jnp.dot(kf, rot, preferred_element_type=jnp.float32)
                  * sin_k_ref[0])
        kb = jnp.broadcast_to(k_rope.astype(k_ref.dtype)[None], (n_rep, tk, d))
        vb = jnp.broadcast_to(v_ref[0, 0][None], (n_rep, tk, d))

        s = jnp.einsum("rqd,rkd->rqk", q_scr[...], kb,
                       preferred_element_type=jnp.float32)    # (n_rep, tq, tk)

        # Causal mask generated in-kernel (no dense mask DMA).
        row = qi * tq + lax.broadcasted_iota(jnp.int32, (n_rep, tq, tk), 1)
        col = ki * tk + lax.broadcasted_iota(jnp.int32, (n_rep, tq, tk), 2)
        s = jnp.where(col <= row, s, -1e30)

        m_prev = m_scr[...]
        m_new = jnp.maximum(m_prev, jnp.max(s, axis=-1, keepdims=True))
        alpha = jnp.exp(m_prev - m_new)
        p = jnp.exp(s - m_new)                                # f32
        l_scr[...] = alpha * l_scr[...] + jnp.sum(p, axis=-1, keepdims=True)
        acc_scr[...] = alpha * acc_scr[...] + jnp.einsum(
            "rqk,rkd->rqd", p.astype(vb.dtype), vb,
            preferred_element_type=jnp.float32)
        m_scr[...] = m_new

    @pl.when(ki == nk - 1)
    def _finalize():
        inv_l = pl.reciprocal(l_scr[...], approx=True)
        o_ref[0] = (acc_scr[...] * inv_l).astype(o_ref.dtype)


def flash_attention(q, k, v, cos, sin, rot, scaling, *, tq=128, tk=128):
    """q: (B, H, S, D); k, v: (B, Hkv, S, D); cos, sin: (B, S, D); rot: (D, D)."""
    B, H, S, D = q.shape
    Hkv = k.shape[1]
    n_rep = H // Hkv
    tq = min(tq, S)
    tk = min(tk, S)
    assert S % tq == 0 and S % tk == 0, "seq length must be divisible by tiles"

    kernel = functools.partial(_flash_attn_kernel, scaling=scaling)
    grid = (B, Hkv, S // tq, S // tk)

    return pl.pallas_call(
        kernel,
        grid=grid,
        in_specs=[
            pl.BlockSpec((1, n_rep, tq, D), lambda b, g, i, j: (b, g, i, 0)),
            pl.BlockSpec((1, 1, tk, D), lambda b, g, i, j: (b, g, j, 0)),
            pl.BlockSpec((1, 1, tk, D), lambda b, g, i, j: (b, g, j, 0)),
            pl.BlockSpec((1, tq, D), lambda b, g, i, j: (b, i, 0)),  # cos (q rows)
            pl.BlockSpec((1, tq, D), lambda b, g, i, j: (b, i, 0)),  # sin (q rows)
            pl.BlockSpec((1, tk, D), lambda b, g, i, j: (b, j, 0)),  # cos (k rows)
            pl.BlockSpec((1, tk, D), lambda b, g, i, j: (b, j, 0)),  # sin (k rows)
            pl.BlockSpec((D, D), lambda b, g, i, j: (0, 0)),
        ],
        out_specs=pl.BlockSpec((1, n_rep, tq, D), lambda b, g, i, j: (b, g, i, 0)),
        out_shape=jax.ShapeDtypeStruct((B, H, S, D), q.dtype),
        scratch_shapes=[
            pltpu.VMEM((n_rep, tq, 1), jnp.float32),   # running max
            pltpu.VMEM((n_rep, tq, 1), jnp.float32),   # running sum
            pltpu.VMEM((n_rep, tq, D), jnp.float32),   # output accumulator
            pltpu.VMEM((n_rep, tq, D), q.dtype),       # cached RoPE'd Q tile
        ],
        compiler_params=pltpu.CompilerParams(
            dimension_semantics=("parallel", "parallel", "parallel", "arbitrary"),
            vmem_limit_bytes=_vmem_limit_bytes(),
        ),
    )(q, k, v, cos, sin, cos, sin, rot)


# ------------------------------- RoPE (glue) ---------------------------------
def rotate_half(x):
    x1, x2 = jnp.split(x, 2, axis=-1)
    return jnp.concatenate([-x2, x1], axis=-1)


def apply_rotary_pos_emb(q, k, cos, sin):
    cos = cos[:, None, :, :]
    sin = sin[:, None, :, :]
    return q * cos + rotate_half(q) * sin, k * cos + rotate_half(k) * sin


def rotary_embedding(positions, head_dim, base):
    inv_freq = 1.0 / (base ** (jnp.arange(0, head_dim, 2, dtype=jnp.float32) / head_dim))
    freqs = positions[..., None].astype(jnp.float32) * inv_freq[None, None, :]
    emb = jnp.concatenate([freqs, freqs], axis=-1)  # (B, S, D)
    return jnp.cos(emb), jnp.sin(emb)


# ------------------------------ parameters ----------------------------------
def init_params(key, cfg):
    hs = cfg.hidden_size
    head_dim = getattr(cfg, "head_dim", hs // cfg.num_attention_heads)
    nq = cfg.num_attention_heads * head_dim
    nkv = cfg.num_key_value_heads * head_dim
    kq, kb, ko = jax.random.split(key, 3)

    def u(k, shape, fan_in):
        bound = 1.0 / np.sqrt(fan_in)
        return jax.random.uniform(k, shape, jnp.float32, -bound, bound)

    # Weights stored pre-transposed as (in, out); q/k/v fused along out.
    return dict(
        qkv_w=u(kq, (hs, nq + 2 * nkv), hs),
        qkv_b=u(kb, (nq + 2 * nkv,), hs),
        o_w=u(ko, (nq, hs), nq),   # o_proj has no bias
    )


# ----------------------------- forward pass ----------------------------------
def qwen2_attention_forward(hidden_states, position_embeddings, attention_mask,
                            params, cfg, *, q_block=128, kv_block=128):
    del attention_mask  # causal mask is generated in-kernel (is_causal=True)
    B, S, hidden = hidden_states.shape
    H, Hkv = cfg.num_attention_heads, cfg.num_key_value_heads
    head_dim = getattr(cfg, "head_dim", hidden // H)
    nq, nkv = H * head_dim, Hkv * head_dim
    scaling = head_dim ** -0.5

    # Fused QKV projection: one tiled GEMM, activations read once.
    x2d = hidden_states.reshape(B * S, hidden)
    qkv = linear(x2d, params["qkv_w"], params["qkv_b"])      # (B*S, nq + 2*nkv)
    q = qkv[:, :nq].reshape(B, S, H, head_dim).transpose(0, 2, 1, 3)
    k = qkv[:, nq:nq + nkv].reshape(B, S, Hkv, head_dim).transpose(0, 2, 1, 3)
    v = qkv[:, nq + nkv:].reshape(B, S, Hkv, head_dim).transpose(0, 2, 1, 3)

    cos, sin = position_embeddings
    rot = _rotate_half_matrix(head_dim)

    # Flash attention with fused RoPE, in-kernel causal mask and GQA reuse.
    attn_out = flash_attention(q, k, v, cos, sin, rot, scaling,
                               tq=q_block, tk=kv_block)

    attn_out = attn_out.transpose(0, 2, 1, 3).reshape(B * S, nq)
    out = linear(attn_out, params["o_w"], None).reshape(B, S, hidden)
    # attn_weights are not materialized by the flash kernel (same as HF flash/sdpa).
    return out, None


# ------------------------- pure-JAX reference check --------------------------
def reference_forward(hidden_states, position_embeddings, params, cfg):
    B, S, hidden = hidden_states.shape
    H, Hkv = cfg.num_attention_heads, cfg.num_key_value_heads
    D = getattr(cfg, "head_dim", hidden // H)
    n_rep = H // Hkv
    nq, nkv = H * D, Hkv * D
    scaling = D ** -0.5

    qkv = hidden_states @ params["qkv_w"] + params["qkv_b"]
    q = qkv[..., :nq].reshape(B, S, H, D).transpose(0, 2, 1, 3)
    k = qkv[..., nq:nq + nkv].reshape(B, S, Hkv, D).transpose(0, 2, 1, 3)
    v = qkv[..., nq + nkv:].reshape(B, S, Hkv, D).transpose(0, 2, 1, 3)

    cos, sin = position_embeddings
    q, k = apply_rotary_pos_emb(q, k, cos, sin)
    k = jnp.repeat(k, n_rep, axis=1)
    v = jnp.repeat(v, n_rep, axis=1)

    neg = jnp.finfo(jnp.float32).min
    causal = jnp.where(jnp.tril(jnp.ones((S, S), dtype=bool)), 0.0, neg)
    s = jnp.einsum("bhqd,bhkd->bhqk", q, k) * scaling + causal[None, None]
    p = jax.nn.softmax(s.astype(jnp.float32), axis=-1)
    o = jnp.einsum("bhqk,bhkd->bhqd", p, v)
    o = o.transpose(0, 2, 1, 3).reshape(B, S, nq)
    return o @ params["o_w"]


# --------------------------------- main --------------------------------------
if __name__ == "__main__":
    cfg = Qwen2Config()
    B, S = 2, 16
    head_dim = cfg.hidden_size // cfg.num_attention_heads

    key = jax.random.PRNGKey(0)
    kx, kp = jax.random.split(key)
    hidden_states = jax.random.normal(kx, (B, S, cfg.hidden_size), jnp.float32)
    params = init_params(kp, cfg)

    positions = jnp.broadcast_to(jnp.arange(S)[None, :], (B, S))
    cos, sin = rotary_embedding(positions, head_dim, cfg.rope_theta)

    # Small tiles so the online-softmax multi-tile path is actually exercised.
    out, attn_w = qwen2_attention_forward(
        hidden_states, (cos, sin), None, params, cfg, q_block=8, kv_block=8)
    out = jax.block_until_ready(out)

    ref_out = reference_forward(hidden_states, (cos, sin), params, cfg)
    ref_out = jax.block_until_ready(ref_out)

    assert out.shape == (B, S, cfg.hidden_size)
    assert attn_w is None
    assert np.allclose(np.asarray(out), np.asarray(ref_out), atol=1e-2, rtol=1e-2)
    print("KERNEL_OK")
</pallas_src>

<mosaic_0001>
module attributes {stable_mosaic.version = 11 : i64} {
  func.func @_linear_kernel(%arg0: i32, %arg1: i32, %arg2: i32, %arg3: memref<32x32xf32, #tpu.memory_space<vmem>>, %arg4: memref<32x64xf32, #tpu.memory_space<vmem>>, %arg5: memref<1x64xf32, #tpu.memory_space<vmem>>, %arg6: memref<32x64xf32, #tpu.memory_space<vmem>>, %arg7: memref<32x64xf32, #tpu.memory_space<vmem>>) attributes {dimension_semantics = [#tpu.dimension_semantics<parallel>, #tpu.dimension_semantics<parallel>, #tpu.dimension_semantics<arbitrary>], iteration_bounds = array<i64: 1, 1, 1>, scalar_prefetch = 0 : i64, scratch_operands = 1 : i64, tpu.core_type = #tpu.core_type<tc>, window_params = [{transform_indices = @transform_0, window_bounds = array<i64: 32, 32>}, {transform_indices = @transform_1, window_bounds = array<i64: 32, 64>}, {transform_indices = @transform_2, window_bounds = array<i64: 1, 64>}, {transform_indices = @transform_3, window_bounds = array<i64: 32, 64>}]} {
    %c0_i32 = arith.constant 0 : i32
    %0 = arith.cmpi eq, %arg2, %c0_i32 : i32
    %1 = arith.extui %0 : i1 to i32
    %c0_i32_0 = arith.constant 0 : i32
    %2 = arith.cmpi ne, %1, %c0_i32_0 : i32
    scf.if %2 {
      %cst_10 = arith.constant 0.000000e+00 : f32
      %12 = vector.broadcast %cst_10 : f32 to vector<32x64xf32>
      %c0_11 = arith.constant 0 : index
      %c0_12 = arith.constant 0 : index
      %13 = vector.load %arg7[%c0_11, %c0_12] : memref<32x64xf32, #tpu.memory_space<vmem>>, vector<32x64xf32>
      tpu.vector_store %arg7[%c0_11, %c0_12], %12 {strides = array<i32>} : memref<32x64xf32, #tpu.memory_space<vmem>>, vector<32x64xf32>,
    } else {
    }
    %c0 = arith.constant 0 : index
    %c0_1 = arith.constant 0 : index
    %3 = vector.load %arg7[%c0, %c0_1] : memref<32x64xf32, #tpu.memory_space<vmem>>, vector<32x64xf32>
    %c0_2 = arith.constant 0 : index
    %c0_3 = arith.constant 0 : index
    %4 = vector.load %arg3[%c0_2, %c0_3] : memref<32x32xf32, #tpu.memory_space<vmem>>, vector<32x32xf32>
    %c0_4 = arith.constant 0 : index
    %c0_5 = arith.constant 0 : index
    %5 = vector.load %arg4[%c0_4, %c0_5] : memref<32x64xf32, #tpu.memory_space<vmem>>, vector<32x64xf32>
    %cst = arith.constant dense<0.000000e+00> : vector<32x64xf32>
    %6 = tpu.matmul %4, %5, %cst {dimension_numbers = #tpu.dot_dimension_numbers<[1], [0], [0], [1], [0, 0, 1, 1], [], []>} : vector<32x32xf32>, vector<32x64xf32>, vector<32x64xf32> -> vector<32x64xf32>
    %7 = arith.addf %3, %6 : vector<32x64xf32>
    %c0_6 = arith.constant 0 : index
    %c0_7 = arith.constant 0 : index
    %8 = vector.load %arg7[%c0_6, %c0_7] : memref<32x64xf32, #tpu.memory_space<vmem>>, vector<32x64xf32>
    tpu.vector_store %arg7[%c0_6, %c0_7], %7 {strides = array<i32>} : memref<32x64xf32, #tpu.memory_space<vmem>>, vector<32x64xf32>,
    %c0_i32_8 = arith.constant 0 : i32
    %9 = arith.cmpi eq, %arg2, %c0_i32_8 : i32
    %10 = arith.extui %9 : i1 to i32
    %c0_i32_9 = arith.constant 0 : i32
    %11 = arith.cmpi ne, %10, %c0_i32_9 : i32
    scf.if %11 {
      %c0_10 = arith.constant 0 : index
      %c0_11 = arith.constant 0 : index
      %12 = vector.load %arg7[%c0_10, %c0_11] : memref<32x64xf32, #tpu.memory_space<vmem>>, vector<32x64xf32>
      %c0_12 = arith.constant 0 : index
      %c0_13 = arith.constant 0 : index
      %13 = vector.load %arg5[%c0_12, %c0_13] : memref<1x64xf32, #tpu.memory_space<vmem>>, vector<1x64xf32>
      %14 = vector.broadcast %13 : vector<1x64xf32> to vector<32x64xf32>
      %15 = arith.addf %12, %14 : vector<32x64xf32>
      %c0_14 = arith.constant 0 : index
      %c0_15 = arith.constant 0 : index
      %16 = vector.load %arg6[%c0_14, %c0_15] : memref<32x64xf32, #tpu.memory_space<vmem>>, vector<32x64xf32>
      tpu.vector_store %arg6[%c0_14, %c0_15], %15 {strides = array<i32>} : memref<32x64xf32, #tpu.memory_space<vmem>>, vector<32x64xf32>,
    } else {
    }
    return
  }
  func.func @transform_0(%arg0: i32, %arg1: i32, %arg2: i32) -> (i32, i32) {
    %c0_i32 = arith.constant 0 : i32
    return %arg0, %arg2 : i32, i32
  }
  func.func @transform_1(%arg0: i32, %arg1: i32, %arg2: i32) -> (i32, i32) {
    %c0_i32 = arith.constant 0 : i32
    return %arg2, %arg1 : i32, i32
  }
  func.func @transform_2(%arg0: i32, %arg1: i32, %arg2: i32) -> (i32, i32) {
    %c0_i32 = arith.constant 0 : i32
    %c0_i32_0 = arith.constant 0 : i32
    return %c0_i32, %arg1 : i32, i32
  }
  func.func @transform_3(%arg0: i32, %arg1: i32, %arg2: i32) -> (i32, i32) {
    %c0_i32 = arith.constant 0 : i32
    return %arg0, %arg1 : i32, i32
  }
}

</mosaic_0001>

<bundles_post_ra>
// kernel: tpu_custom_call.1
= control target key start
LH: loop header
LB: loop body
LE: loop exit
PB: predicated region body
PF: predicated region fallthrough
CT: control target
= control target key end

     0   :  { %8 = vsyncpa [#allocation4], 0  ;;  %s377_s0 = inlined_call_operand.hbm [shape: f32[32,32], index: 0, kind: input, shape index: {}]   ;;  %s378_s1 = inlined_call_operand.hbm [shape: f32[32,64], index: 1, kind: input, shape index: {}]   ;;  %s379_s2 = inlined_call_operand.vmem [shape: f32[1,64], index: 2, kind: input, shape index: {}]   ;;  %s380_s3 = inlined_call_operand.hbm [shape: f32[32,64], index: 3, kind: output, shape index: {}]  }
   0x1   :  { %9 = vsyncpa [#allocation7], 0 }
   0x2   :  { %10 = vsyncpa [#allocation5], 0  ;;  %s318_s12 = smov [#allocation3]  }
   0x3   :  { %s16_s13 = sshll.u32 %s318_s12, 4  ;;  %s17_s13 = int_to_ptr.vmem [resolvable:$true] %s16_s13 }
   0x4   :  { %s260_s14 = scalar_lea.vmem %s17_s13, 512  ;;  %p265_p1 = scmp.lt.s32.totalorder %s17_s13, %s17_s13 }
   0x5   :  { %p261_p0 = scmp.ne.s32.totalorder %s17_s13, %s260_s14  ;;  %p266_p2 = scmp.lt.s32.totalorder %s260_s14, %s260_s14 }
   0x7   :  { %p267_p3 = por %p266_p2, %p265_p1 }
   0x9   :  { %p268_p4 = pnand %p267_p3, %p261_p0 }
   0xb   :  { %271 = shalt.err (!%p268_p4)
}
   0xc   :  { %s319_s15 = smov 128   ;;  %s320_s16 = smov 8  }
   0xd   :  { %22 = dma.hbm_to_vmem [thread:$0]  %s377_s0, 512, %s17_s13, [#allocation4], %s319_s15, %s319_s15, %s320_s16  }
   0xe   :  { %s321_s19 = smov [#allocation6]  }
   0xf   :  { %s28_s20 = sshll.u32 %s321_s19, 4  ;;  %s29_s20 = int_to_ptr.vmem [resolvable:$true] %s28_s20 }
  0x10   :  { %s280_s21 = scalar_lea.vmem %s29_s20, 512  ;;  %p285_p6 = scmp.lt.s32.totalorder %s29_s20, %s29_s20 }
  0x11   :  { %p281_p5 = scmp.ne.s32.totalorder %s29_s20, %s280_s21  ;;  %p286_p7 = scmp.lt.s32.totalorder %s280_s21, %s280_s21 }
  0x13   :  { %p287_p8 = por %p286_p7, %p285_p6 }
  0x15   :  { %p288_p9 = pnand %p287_p8, %p281_p5 }
  0x17   :  { %291 = shalt.err (!%p288_p9)
}
  0x18   :  { %34 = dma.hbm_to_vmem [thread:$0]  %s378_s1, 512, %s29_s20, [#allocation7], %s319_s15, %s319_s15, %s320_s16  }
  0x19   :  { %312 = dma.done.wait [#allocation4], 512  }
  0x1a   :  { %313 = vsyncadd [#allocation4], 4294966784 }
  0x1b   :  { %314 = dma.done.wait [#allocation7], 512  }
  0x1c   :  { %315 = vsyncadd [#allocation7], 4294966784  ;;  %vm47_vm0 = vcmask 523264   ;;  %v322_v0 = vmov 0.0   ;;  %v63_v1 = vld [vmem:[#allocation6 + $0x18] sm:$0xff]  ;;  %v62_v2 = vld [vmem:[#allocation6 + $0x10] sm:$0xff] }
  0x1d   :  { %49 = vst.msk [vmem:[#allocation2 + $0x8] sm:$0xff] %vm47_vm0, %v322_v0  ;;  %48 = vst.msk [vmem:[#allocation2] sm:$0xff] %vm47_vm0, %v322_v0  ;;  %224 = vmatprep.subr.mxu0 %v63_v1  ;;  %238 = vmatprep.subr.mxu1 %v63_v1  ;;  %v61_v3 = vld [vmem:[#allocation6 + $0x8] sm:$0xff]  ;;  %v60_v4 = vld [vmem:[#allocation6] sm:$0xff]  ;;  %vm64_vm1 = vcmask 261120   ;;  %s323_s24 = smov [#allocation8]  }
  0x1e   :  { %50 = vst.msk [vmem:[#allocation2 + $0x10] sm:$0xff] %vm47_vm0, %v322_v0  ;;  %51 = vst.msk [vmem:[#allocation2 + $0x18] sm:$0xff] %vm47_vm0, %v322_v0  ;;  %225 = vmatpush3.msra.mxu0 %v63_v1  ;;  %242 = vmatpush3.msra.mxu1 %v63_v1  ;;  %v56_v5 = vld [vmem:[#allocation3] sm:$0xff]  ;;  %v58_v6 = vld [vmem:[#allocation3 + $0x10] sm:$0xff]  ;;  %s198_s25 = sshll.u32 %s323_s24, 4  ;;  %s199_s25 = int_to_ptr.vmem [resolvable:$true] %s198_s25 }
  0x1f   :  { %226 = vmatprep.subr.mxu0 %v62_v2  ;;  %239 = vmatprep.subr.mxu1 %v62_v2  ;;  %v57_v7 = vld [vmem:[#allocation3 + $0x8] sm:$0xff]  ;;  %v59_v8 = vld [vmem:[#allocation3 + $0x18] sm:$0xff]  ;;  %v215_v21 = vld [vmem:[%s379_s2] ss:$0 sm:$0xff]  ;;  %s292_s2 = scalar_lea.vmem %s199_s25, 512  ;;  %p297_p11 = scmp.lt.s32.totalorder %s199_s25, %s199_s25 }
  0x20   :  { %227 = vmatpush3.msra.mxu0 %v62_v2  ;;  %243 = vmatpush3.msra.mxu1 %v62_v2  ;;  %p293_p10 = scmp.ne.s32.totalorder %s199_s25, %s292_s2  ;;  %p298_p12 = scmp.lt.s32.totalorder %s292_s2, %s292_s2 }
  0x21   :  { %228 = vmatprep.subr.mxu0 %v61_v3  ;;  %240 = vmatprep.subr.mxu1 %v61_v3 }
  0x22   :  { %229 = vmatpush3.msra.mxu0 %v61_v3  ;;  %244 = vmatpush3.msra.mxu1 %v61_v3  ;;  %p299_p13 = por %p298_p12, %p297_p11 }
  0x23   :  { %230 = vmatprep.subr.mxu0 %v60_v4  ;;  %241 = vmatprep.subr.mxu1 %v60_v4 }
  0x24   :  { %231 = vmatpush3.msra.mxu0 %v60_v4  ;;  %245 = vmatpush3.msra.mxu1 %v60_v4  ;;  %v53_v9 = vld [vmem:[#allocation2 + $0x8] sm:$0xff]  ;;  %v52_v13 = vld [vmem:[#allocation2] sm:$0xff]  ;;  %p300_p0 = pnand %p299_p13, %p293_p10 }
  0x25   :  { %232 = vmatprep.mubr.msk.f32.mxu0 %vm64_vm1, %v56_v5  ;;  %235 = vmatprep.mubr.msk.f32.mxu1 %vm64_vm1, %v58_v6  ;;  %v55_v10 = vld [vmem:[#allocation2 + $0x18] sm:$0xff]  ;;  %v54_v14 = vld [vmem:[#allocation2 + $0x10] sm:$0xff] }
  0x26   :  { %233 = vmatmul.mubr.msk.f32.vlgmr.msra.gmra.mxu0 %vm64_vm1, %v57_v7  ;;  %236 = vmatmul.mubr.msk.f32.vlgmr.msra.gmra.mxu1 %vm64_vm1, %v59_v8 }
  0xe6   :  { %v234_v11 = vpop.f32.mrf.mxu0  ;;  %v237_v12 = vpop.f32.mrf.mxu1 }
  0xe7   :  { %v163_v15 = vadd.f32 %v234_v11, %v53_v9  ;;  %v165_v16 = vadd.f32 %v237_v12, %v55_v10 }
  0xe8   :  { %v143_v17 = vpop.f32.mrf.mxu0  ;;  %v153_v18 = vpop.f32.mrf.mxu1 }
  0xe9   :  { %168 = vst.msk [vmem:[#allocation2 + $0x8] sm:$0xff] %vm47_vm0, %v163_v15  ;;  %170 = vst.msk [vmem:[#allocation2 + $0x18] sm:$0xff] %vm47_vm0, %v165_v16  ;;  %v162_v19 = vadd.f32 %v143_v17, %v52_v13  ;;  %v164_v20 = vadd.f32 %v153_v18, %v54_v14 }
  0xeb   :  { %167 = vst.msk [vmem:[#allocation2] sm:$0xff] %vm47_vm0, %v162_v19  ;;  %169 = vst.msk [vmem:[#allocation2 + $0x10] sm:$0xff] %vm47_vm0, %v164_v20 }
  0xf0   :  { %v175_v22 = vld [vmem:[#allocation2 + $0x8] sm:$0xff]  ;;  %v177_v23 = vld [vmem:[#allocation2 + $0x18] sm:$0xff] }
  0xf1   :  { %v186_v24 = vadd.f32 %v215_v21, %v175_v22  ;;  %v188_v25 = vadd.f32 %v215_v21, %v177_v23 }
  0xf2   :  { %v174_v26 = vld [vmem:[#allocation2] sm:$0xff]  ;;  %v176_v27 = vld [vmem:[#allocation2 + $0x10] sm:$0xff] }
  0xf3   :  { %v185_v28 = vadd.f32 %v215_v21, %v174_v26  ;;  %v187_v29 = vadd.f32 %v215_v21, %v176_v27  ;;  %190 = vst.msk [vmem:[#allocation8 + $0x8] sm:$0xff] %vm47_vm0, %v186_v24  ;;  %192 = vst.msk [vmem:[#allocation8 + $0x18] sm:$0xff] %vm47_vm0, %v188_v25 }
  0xf5   :  { %189 = vst.msk [vmem:[#allocation8] sm:$0xff] %vm47_vm0, %v185_v28  ;;  %191 = vst.msk [vmem:[#allocation8 + $0x10] sm:$0xff] %vm47_vm0, %v187_v29 }
  0xf6   :  { %303 = shalt.err (!%p300_p0)
}
  0xf7   :  { %204 = dma.vmem_to_hbm [thread:$0]  %s199_s25, 512, %s380_s3, [#allocation5], %s319_s15, %s319_s15, %s320_s16  }
  0xf8   :  { %316 = dma.done.wait [#allocation5], 512  }
  0xf9   :  { %317 = vsyncadd [#allocation5], 4294966784 }
  0xfa   :  { %208 = vsyncpa [#allocation4], 1 }
  0xfb   :  { %209 = vsyncpa [#allocation7], 1 }
  0xfc   :  { %210 = vsyncpa [#allocation5], 1 }

</bundles_post_ra>
